<compile_context>
chip_gen: v5e
topology: v5e:2x2
jax: 0.10.0
libtpu: 0.0.40
codegen_flags: <defaults>
</compile_context>

<pallas_src>
import jax
import jax.numpy as jnp
from jax.experimental import pallas as pl
from jax.experimental.pallas import tpu as pltpu

LANE = 128
SUBLANE = 8


def _round_up(n, m):
    return (n + m - 1) // m * m


def _pad2d(a, rows, cols):
    pr, pc = rows - a.shape[0], cols - a.shape[1]
    if pr or pc:
        a = jnp.pad(a, ((0, pr), (0, pc)))
    return a


def ffn_kernel(x_ref, w1_ref, b1_ref, w2_ref, b2_ref, w3_ref, b3_ref, o_ref):
    """Fused 3-layer MLP for one (tb, Dp) batch tile."""
    x = x_ref[...]                                               # (tb, Dp) bf16

    # Layer 1: bf16 MXU matmul, f32 accumulation; bias + ReLU in f32 on the VPU.
    h1 = jnp.dot(x, w1_ref[...], preferred_element_type=jnp.float32)
    h1 = jnp.maximum(h1 + b1_ref[...], 0.0)                      # (tb, D1p) f32

    # Layer 2: cast the intermediate back to bf16 for the MXU.
    h2 = jnp.dot(h1.astype(w2_ref.dtype), w2_ref[...],
                 preferred_element_type=jnp.float32)
    h2 = jnp.maximum(h2 + b2_ref[...], 0.0)                      # (tb, D2p) f32

    # Layer 3 (out_features == 1): VPU multiply + XLU row reduction instead of
    # an N=1 MXU matmul. w3_ref is the weight column stored as a (1, D2p) row.
    o = jnp.sum(h2 * w3_ref[...], axis=-1, keepdims=True) + b3_ref[...]
    o_ref[...] = o.astype(o_ref.dtype)


def ffn_pallas(x, w1, b1, w2, b2, w3, b3, *, batch_tile=256):
    """x: (B, D); w_i: (in, out) (transposed vs nn.Linear); b_i: (1, out)."""
    B, D = x.shape
    D1 = w1.shape[1]
    D2 = w2.shape[1]
    DO = w3.shape[1]
    assert DO == 1, "layer-3 VPU reduction path assumes out_features == 1"
    out_dtype = x.dtype

    # ---- pad to hardware-friendly shapes (zero padding is semantically neutral).
    Dp, D1p, D2p = (_round_up(d, LANE) for d in (D, D1, D2))
    Bp = _round_up(B, SUBLANE)

    # Batch tile: multiple of 8 sublanes that divides the padded batch.
    tb = max(SUBLANE, (min(batch_tile, Bp) // SUBLANE) * SUBLANE)
    while Bp % tb:
        tb -= SUBLANE
    grid = (Bp // tb,)

    x_p = _pad2d(x, Bp, Dp).astype(jnp.bfloat16)
    w1_p = _pad2d(w1, Dp, D1p).astype(jnp.bfloat16)
    b1_p = _pad2d(b1, 1, D1p).astype(jnp.float32)
    w2_p = _pad2d(w2, D1p, D2p).astype(jnp.bfloat16)
    b2_p = _pad2d(b2, 1, D2p).astype(jnp.float32)
    w3_p = _pad2d(w3.reshape(1, D2), 1, D2p).astype(jnp.float32)  # row vector
    b3_p = b3.reshape(1, 1).astype(jnp.float32)

    cost = pl.CostEstimate(
        flops=2 * Bp * (Dp * D1p + D1p * D2p + D2p * DO),
        transcendentals=0,
        bytes_accessed=int(
            x_p.size * 2 + (w1_p.size + w2_p.size) * 2
            + (b1_p.size + b2_p.size + w3_p.size + b3_p.size) * 4
            + Bp * DO * 4
        ),
    )

    def vmem_bytes(single_buffer_consts):
        const = ((Dp * D1p + D1p * D2p) * 2                 # bf16 weights
                 + (D1p + D2p + D2p + 1) * 4)               # f32 biases + w3 row
        nbuf = 1 if single_buffer_consts else 2
        io = 2 * tb * Dp * 2 + 2 * tb * DO * 4              # double-buffered x / out
        tmp = tb * (D1p + D2p) * 4 + tb * D1p * 2           # h1/h2 f32 + h1 bf16
        return const * nbuf + io + tmp

    def build(single_buffer_consts):
        const_kwargs = {}
        if single_buffer_consts:
            # Constant-index blocks are never re-fetched; single-buffer them to
            # halve their VMEM footprint (important on v7x's 64 MiB VMEM).
            const_kwargs = dict(pipeline_mode=pl.Buffered(1))

        def const_spec(shape):
            return pl.BlockSpec(shape, lambda i: (0, 0), **const_kwargs)

        needed = vmem_bytes(single_buffer_consts)
        vmem_limit = int(min(max(2 * needed, 32 << 20), 64 << 20))
        vmem_limit = max(vmem_limit, needed + (2 << 20))
        # TODO(synk): at production sizes where the full weight set exceeds VMEM
        # (esp. v7x 64 MiB), add an "arbitrary" K-tiling grid axis over D1 with a
        # pl.when-managed f32 accumulator instead of keeping weights resident.

        return pl.pallas_call(
            ffn_kernel,
            out_shape=jax.ShapeDtypeStruct((Bp, DO), out_dtype),
            grid_spec=pltpu.PrefetchScalarGridSpec(
                num_scalar_prefetch=0,
                grid=grid,
                in_specs=[
                    pl.BlockSpec((tb, Dp), lambda i: (i, 0)),   # x: batch-tiled
                    const_spec((Dp, D1p)),                      # w1
                    const_spec((1, D1p)),                       # b1
                    const_spec((D1p, D2p)),                     # w2
                    const_spec((1, D2p)),                       # b2
                    const_spec((1, D2p)),                       # w3 (as a row)
                    const_spec((1, 1)),                         # b3
                ],
                out_specs=pl.BlockSpec((tb, DO), lambda i: (i, 0)),
            ),
            compiler_params=pltpu.CompilerParams(
                dimension_semantics=("parallel",),
                vmem_limit_bytes=vmem_limit,
            ),
            cost_estimate=cost,
        )

    args = (x_p, w1_p, b1_p, w2_p, b2_p, w3_p, b3_p)
    if hasattr(pl, "Buffered"):
        try:
            return build(True)(*args)[:B]
        except Exception:
            # pipeline_mode=Buffered(1) unsupported -> default double-buffering.
            pass
    return build(False)(*args)[:B]


def ffn_reference(x, w1, b1, w2, b2, w3, b3, compute_dtype=None):
    """Pure-JAX reference. With compute_dtype=bf16 it mirrors the kernel's
    precision strategy (bf16 matmul inputs, f32 accumulation, f32 layer 3)."""
    cd = x.dtype if compute_dtype is None else compute_dtype
    h1 = jax.nn.relu(jnp.dot(x.astype(cd), w1.astype(cd),
                             preferred_element_type=jnp.float32) + b1)
    h2 = jax.nn.relu(jnp.dot(h1.astype(cd), w2.astype(cd),
                             preferred_element_type=jnp.float32) + b2)
    return jnp.sum(h2 * w3[:, 0][None, :], axis=-1, keepdims=True) + b3


if __name__ == "__main__":
    key = jax.random.PRNGKey(0)
    B = 64               # batch (small demo; batch_tile=16 -> grid of 4 tiles)
    D = 32               # input_size
    D1, D2, DO = 3 * D, 2 * D, 1

    keys = jax.random.split(key, 7)
    x = jax.random.normal(keys[0], (B, D), dtype=jnp.float32)

    # Deterministic parameter init (uniform, mimicking nn.Linear fan-in scaling).
    def init_linear(kw, kb, fan_in, fan_out):
        bound = 1.0 / (fan_in ** 0.5)
        w = jax.random.uniform(kw, (fan_in, fan_out), jnp.float32, -bound, bound)
        b = jax.random.uniform(kb, (1, fan_out), jnp.float32, -bound, bound)
        return w, b

    w1, b1 = init_linear(keys[1], keys[2], D, D1)
    w2, b2 = init_linear(keys[3], keys[4], D1, D2)
    w3, b3 = init_linear(keys[5], keys[6], D2, DO)

    out = ffn_pallas(x, w1, b1, w2, b2, w3, b3, batch_tile=16)
    out = jax.block_until_ready(out)
    assert out.shape == (B, DO), out.shape

    # Tight check vs a reference that uses the same bf16-matmul / f32-accum strategy.
    ref_bf16 = ffn_reference(x, w1, b1, w2, b2, w3, b3, compute_dtype=jnp.bfloat16)
    assert jnp.allclose(out, ref_bf16, atol=2e-3, rtol=2e-3), \
        f"bf16-matched mismatch, max abs err {float(jnp.max(jnp.abs(out - ref_bf16)))}"

    # Loose check vs the full-f32 module semantics (bf16 matmul inputs -> ~1e-2 err).
    ref_f32 = ffn_reference(x, w1, b1, w2, b2, w3, b3)
    assert jnp.allclose(out, ref_f32, atol=6e-2, rtol=6e-2), \
        f"f32 mismatch, max abs err {float(jnp.max(jnp.abs(out - ref_f32)))}"

    print("KERNEL_OK")
</pallas_src>

<mosaic_0001>
module attributes {stable_mosaic.version = 11 : i64} {
  func.func @ffn_kernel(%arg0: i32, %arg1: memref<16x128xbf16, #tpu.memory_space<vmem>>, %arg2: memref<128x128xbf16, #tpu.memory_space<vmem>>, %arg3: memref<1x128xf32, #tpu.memory_space<vmem>>, %arg4: memref<128x128xbf16, #tpu.memory_space<vmem>>, %arg5: memref<1x128xf32, #tpu.memory_space<vmem>>, %arg6: memref<1x128xf32, #tpu.memory_space<vmem>>, %arg7: memref<1x1xf32, #tpu.memory_space<vmem>>, %arg8: memref<16x1xf32, #tpu.memory_space<vmem>>) attributes {dimension_semantics = [#tpu.dimension_semantics<parallel>], iteration_bounds = array<i64: 4>, scalar_prefetch = 0 : i64, scratch_operands = 0 : i64, tpu.core_type = #tpu.core_type<tc>, window_params = [{transform_indices = @transform_0, window_bounds = array<i64: 16, 128>}, {pipeline_mode = #tpu.pipeline_mode<synchronous>, transform_indices = @transform_1, window_bounds = array<i64: 128, 128>}, {pipeline_mode = #tpu.pipeline_mode<synchronous>, transform_indices = @transform_2, window_bounds = array<i64: 1, 128>}, {pipeline_mode = #tpu.pipeline_mode<synchronous>, transform_indices = @transform_3, window_bounds = array<i64: 128, 128>}, {pipeline_mode = #tpu.pipeline_mode<synchronous>, transform_indices = @transform_4, window_bounds = array<i64: 1, 128>}, {pipeline_mode = #tpu.pipeline_mode<synchronous>, transform_indices = @transform_5, window_bounds = array<i64: 1, 128>}, {pipeline_mode = #tpu.pipeline_mode<synchronous>, transform_indices = @transform_6, window_bounds = array<i64: 1, 1>}, {transform_indices = @transform_7, window_bounds = array<i64: 16, 1>}]} {
    %c0 = arith.constant 0 : index
    %c0_0 = arith.constant 0 : index
    %0 = vector.load %arg1[%c0, %c0_0] : memref<16x128xbf16, #tpu.memory_space<vmem>>, vector<16x128xbf16>
    %c0_1 = arith.constant 0 : index
    %c0_2 = arith.constant 0 : index
    %1 = vector.load %arg2[%c0_1, %c0_2] : memref<128x128xbf16, #tpu.memory_space<vmem>>, vector<128x128xbf16>
    %cst = arith.constant dense<0.000000e+00> : vector<16x128xf32>
    %2 = tpu.matmul %0, %1, %cst {dimension_numbers = #tpu.dot_dimension_numbers<[1], [0], [0], [1], [0, 0, 1, 1], [], []>} : vector<16x128xbf16>, vector<128x128xbf16>, vector<16x128xf32> -> vector<16x128xf32>
    %c0_3 = arith.constant 0 : index
    %c0_4 = arith.constant 0 : index
    %3 = vector.load %arg3[%c0_3, %c0_4] : memref<1x128xf32, #tpu.memory_space<vmem>>, vector<1x128xf32>
    %4 = vector.broadcast %3 : vector<1x128xf32> to vector<16x128xf32>
    %5 = arith.addf %2, %4 : vector<16x128xf32>
    %cst_5 = arith.constant 0.000000e+00 : f32
    %6 = vector.broadcast %cst_5 : f32 to vector<16x128xf32>
    %7 = arith.maximumf %5, %6 : vector<16x128xf32>
    %8 = arith.truncf %7 : vector<16x128xf32> to vector<16x128xbf16>
    %c0_6 = arith.constant 0 : index
    %c0_7 = arith.constant 0 : index
    %9 = vector.load %arg4[%c0_6, %c0_7] : memref<128x128xbf16, #tpu.memory_space<vmem>>, vector<128x128xbf16>
    %cst_8 = arith.constant dense<0.000000e+00> : vector<16x128xf32>
    %10 = tpu.matmul %8, %9, %cst_8 {dimension_numbers = #tpu.dot_dimension_numbers<[1], [0], [0], [1], [0, 0, 1, 1], [], []>} : vector<16x128xbf16>, vector<128x128xbf16>, vector<16x128xf32> -> vector<16x128xf32>
    %c0_9 = arith.constant 0 : index
    %c0_10 = arith.constant 0 : index
    %11 = vector.load %arg5[%c0_9, %c0_10] : memref<1x128xf32, #tpu.memory_space<vmem>>, vector<1x128xf32>
    %12 = vector.broadcast %11 : vector<1x128xf32> to vector<16x128xf32>
    %13 = arith.addf %10, %12 : vector<16x128xf32>
    %cst_11 = arith.constant 0.000000e+00 : f32
    %14 = vector.broadcast %cst_11 : f32 to vector<16x128xf32>
    %15 = arith.maximumf %13, %14 : vector<16x128xf32>
    %c0_12 = arith.constant 0 : index
    %c0_13 = arith.constant 0 : index
    %16 = vector.load %arg6[%c0_12, %c0_13] : memref<1x128xf32, #tpu.memory_space<vmem>>, vector<1x128xf32>
    %17 = vector.broadcast %16 : vector<1x128xf32> to vector<16x128xf32>
    %18 = arith.mulf %15, %17 : vector<16x128xf32>
    %cst_14 = arith.constant dense<0.000000e+00> : vector<16xf32>
    %19 = vector.multi_reduction <add>, %18, %cst_14 [1] : vector<16x128xf32> to vector<16xf32>
    %20 = vector.shape_cast %19 : vector<16xf32> to vector<16x1xf32>
    %c0_15 = arith.constant 0 : index
    %c0_16 = arith.constant 0 : index
    %21 = vector.load %arg7[%c0_15, %c0_16] : memref<1x1xf32, #tpu.memory_space<vmem>>, vector<1x1xf32>
    %22 = vector.broadcast %21 : vector<1x1xf32> to vector<16x1xf32>
    %23 = arith.addf %20, %22 : vector<16x1xf32>
    %c0_17 = arith.constant 0 : index
    %c0_18 = arith.constant 0 : index
    %24 = vector.load %arg8[%c0_17, %c0_18] : memref<16x1xf32, #tpu.memory_space<vmem>>, vector<16x1xf32>
    tpu.vector_store %arg8[%c0_17, %c0_18], %23 {strides = array<i32>} : memref<16x1xf32, #tpu.memory_space<vmem>>, vector<16x1xf32>,
    return
  }
  func.func @transform_0(%arg0: i32) -> (i32, i32) {
    %c0_i32 = arith.constant 0 : i32
    %c0_i32_0 = arith.constant 0 : i32
    return %arg0, %c0_i32 : i32, i32
  }
  func.func @transform_1(%arg0: i32) -> (i32, i32) {
    %c0_i32 = arith.constant 0 : i32
    %c0_i32_0 = arith.constant 0 : i32
    %c0_i32_1 = arith.constant 0 : i32
    return %c0_i32, %c0_i32_0 : i32, i32
  }
  func.func @transform_2(%arg0: i32) -> (i32, i32) {
    %c0_i32 = arith.constant 0 : i32
    %c0_i32_0 = arith.constant 0 : i32
    %c0_i32_1 = arith.constant 0 : i32
    return %c0_i32, %c0_i32_0 : i32, i32
  }
  func.func @transform_3(%arg0: i32) -> (i32, i32) {
    %c0_i32 = arith.constant 0 : i32
    %c0_i32_0 = arith.constant 0 : i32
    %c0_i32_1 = arith.constant 0 : i32
    return %c0_i32, %c0_i32_0 : i32, i32
  }
  func.func @transform_4(%arg0: i32) -> (i32, i32) {
    %c0_i32 = arith.constant 0 : i32
    %c0_i32_0 = arith.constant 0 : i32
    %c0_i32_1 = arith.constant 0 : i32
    return %c0_i32, %c0_i32_0 : i32, i32
  }
  func.func @transform_5(%arg0: i32) -> (i32, i32) {
    %c0_i32 = arith.constant 0 : i32
    %c0_i32_0 = arith.constant 0 : i32
    %c0_i32_1 = arith.constant 0 : i32
    return %c0_i32, %c0_i32_0 : i32, i32
  }
  func.func @transform_6(%arg0: i32) -> (i32, i32) {
    %c0_i32 = arith.constant 0 : i32
    %c0_i32_0 = arith.constant 0 : i32
    %c0_i32_1 = arith.constant 0 : i32
    return %c0_i32, %c0_i32_0 : i32, i32
  }
  func.func @transform_7(%arg0: i32) -> (i32, i32) {
    %c0_i32 = arith.constant 0 : i32
    %c0_i32_0 = arith.constant 0 : i32
    return %arg0, %c0_i32 : i32, i32
  }
}

module attributes {stable_mosaic.version = 11 : i64} {
  func.func @ffn_kernel(%arg0: i32, %arg1: memref<16x128xbf16, #tpu.memory_space<vmem>>, %arg2: memref<128x128xbf16, #tpu.memory_space<vmem>>, %arg3: memref<1x128xf32, #tpu.memory_space<vmem>>, %arg4: memref<128x128xbf16, #tpu.memory_space<vmem>>, %arg5: memref<1x128xf32, #tpu.memory_space<vmem>>, %arg6: memref<1x128xf32, #tpu.memory_space<vmem>>, %arg7: memref<1x1xf32, #tpu.memory_space<vmem>>, %arg8: memref<16x1xf32, #tpu.memory_space<vmem>>) attributes {dimension_semantics = [#tpu.dimension_semantics<parallel>], iteration_bounds = array<i64: 4>, scalar_prefetch = 0 : i64, scratch_operands = 0 : i64, tpu.core_type = #tpu.core_type<tc>, window_params = [{transform_indices = @transform_0, window_bounds = array<i64: 16, 128>}, {pipeline_mode = #tpu.pipeline_mode<synchronous>, transform_indices = @transform_1, window_bounds = array<i64: 128, 128>}, {pipeline_mode = #tpu.pipeline_mode<synchronous>, transform_indices = @transform_2, window_bounds = array<i64: 1, 128>}, {pipeline_mode = #tpu.pipeline_mode<synchronous>, transform_indices = @transform_3, window_bounds = array<i64: 128, 128>}, {pipeline_mode = #tpu.pipeline_mode<synchronous>, transform_indices = @transform_4, window_bounds = array<i64: 1, 128>}, {pipeline_mode = #tpu.pipeline_mode<synchronous>, transform_indices = @transform_5, window_bounds = array<i64: 1, 128>}, {pipeline_mode = #tpu.pipeline_mode<synchronous>, transform_indices = @transform_6, window_bounds = array<i64: 1, 1>}, {transform_indices = @transform_7, window_bounds = array<i64: 16, 1>}]} {
    %c0 = arith.constant 0 : index
    %c0_0 = arith.constant 0 : index
    %0 = vector.load %arg1[%c0, %c0_0] : memref<16x128xbf16, #tpu.memory_space<vmem>>, vector<16x128xbf16>
    %c0_1 = arith.constant 0 : index
    %c0_2 = arith.constant 0 : index
    %1 = vector.load %arg2[%c0_1, %c0_2] : memref<128x128xbf16, #tpu.memory_space<vmem>>, vector<128x128xbf16>
    %cst = arith.constant dense<0.000000e+00> : vector<16x128xf32>
    %2 = tpu.matmul %0, %1, %cst {dimension_numbers = #tpu.dot_dimension_numbers<[1], [0], [0], [1], [0, 0, 1, 1], [], []>} : vector<16x128xbf16>, vector<128x128xbf16>, vector<16x128xf32> -> vector<16x128xf32>
    %c0_3 = arith.constant 0 : index
    %c0_4 = arith.constant 0 : index
    %3 = vector.load %arg3[%c0_3, %c0_4] : memref<1x128xf32, #tpu.memory_space<vmem>>, vector<1x128xf32>
    %4 = vector.broadcast %3 : vector<1x128xf32> to vector<16x128xf32>
    %5 = arith.addf %2, %4 : vector<16x128xf32>
    %cst_5 = arith.constant 0.000000e+00 : f32
    %6 = vector.broadcast %cst_5 : f32 to vector<16x128xf32>
    %7 = arith.maximumf %5, %6 : vector<16x128xf32>
    %8 = arith.truncf %7 : vector<16x128xf32> to vector<16x128xbf16>
    %c0_6 = arith.constant 0 : index
    %c0_7 = arith.constant 0 : index
    %9 = vector.load %arg4[%c0_6, %c0_7] : memref<128x128xbf16, #tpu.memory_space<vmem>>, vector<128x128xbf16>
    %cst_8 = arith.constant dense<0.000000e+00> : vector<16x128xf32>
    %10 = tpu.matmul %8, %9, %cst_8 {dimension_numbers = #tpu.dot_dimension_numbers<[1], [0], [0], [1], [0, 0, 1, 1], [], []>} : vector<16x128xbf16>, vector<128x128xbf16>, vector<16x128xf32> -> vector<16x128xf32>
    %c0_9 = arith.constant 0 : index
    %c0_10 = arith.constant 0 : index
    %11 = vector.load %arg5[%c0_9, %c0_10] : memref<1x128xf32, #tpu.memory_space<vmem>>, vector<1x128xf32>
    %12 = vector.broadcast %11 : vector<1x128xf32> to vector<16x128xf32>
    %13 = arith.addf %10, %12 : vector<16x128xf32>
    %cst_11 = arith.constant 0.000000e+00 : f32
    %14 = vector.broadcast %cst_11 : f32 to vector<16x128xf32>
    %15 = arith.maximumf %13, %14 : vector<16x128xf32>
    %c0_12 = arith.constant 0 : index
    %c0_13 = arith.constant 0 : index
    %16 = vector.load %arg6[%c0_12, %c0_13] : memref<1x128xf32, #tpu.memory_space<vmem>>, vector<1x128xf32>
    %17 = vector.broadcast %16 : vector<1x128xf32> to vector<16x128xf32>
    %18 = arith.mulf %15, %17 : vector<16x128xf32>
    %cst_14 = arith.constant dense<0.000000e+00> : vector<16xf32>
    %19 = vector.multi_reduction <add>, %18, %cst_14 [1] : vector<16x128xf32> to vector<16xf32>
    %20 = vector.shape_cast %19 : vector<16xf32> to vector<16x1xf32>
    %c0_15 = arith.constant 0 : index
    %c0_16 = arith.constant 0 : index
    %21 = vector.load %arg7[%c0_15, %c0_16] : memref<1x1xf32, #tpu.memory_space<vmem>>, vector<1x1xf32>
    %22 = vector.broadcast %21 : vector<1x1xf32> to vector<16x1xf32>
    %23 = arith.addf %20, %22 : vector<16x1xf32>
    %c0_17 = arith.constant 0 : index
    %c0_18 = arith.constant 0 : index
    %24 = vector.load %arg8[%c0_17, %c0_18] : memref<16x1xf32, #tpu.memory_space<vmem>>, vector<16x1xf32>
    tpu.vector_store %arg8[%c0_17, %c0_18], %23 {strides = array<i32>} : memref<16x1xf32, #tpu.memory_space<vmem>>, vector<16x1xf32>,
    return
  }
  func.func @transform_0(%arg0: i32) -> (i32, i32) {
    %c0_i32 = arith.constant 0 : i32
    %c0_i32_0 = arith.constant 0 : i32
    return %arg0, %c0_i32 : i32, i32
  }
  func.func @transform_1(%arg0: i32) -> (i32, i32) {
    %c0_i32 = arith.constant 0 : i32
    %c0_i32_0 = arith.constant 0 : i32
    %c0_i32_1 = arith.constant 0 : i32
    return %c0_i32, %c0_i32_0 : i32, i32
  }
  func.func @transform_2(%arg0: i32) -> (i32, i32) {
    %c0_i32 = arith.constant 0 : i32
    %c0_i32_0 = arith.constant 0 : i32
    %c0_i32_1 = arith.constant 0 : i32
    return %c0_i32, %c0_i32_0 : i32, i32
  }
  func.func @transform_3(%arg0: i32) -> (i32, i32) {
    %c0_i32 = arith.constant 0 : i32
    %c0_i32_0 = arith.constant 0 : i32
    %c0_i32_1 = arith.constant 0 : i32
    return %c0_i32, %c0_i32_0 : i32, i32
  }
  func.func @transform_4(%arg0: i32) -> (i32, i32) {
    %c0_i32 = arith.constant 0 : i32
    %c0_i32_0 = arith.constant 0 : i32
    %c0_i32_1 = arith.constant 0 : i32
    return %c0_i32, %c0_i32_0 : i32, i32
  }
  func.func @transform_5(%arg0: i32) -> (i32, i32) {
    %c0_i32 = arith.constant 0 : i32
    %c0_i32_0 = arith.constant 0 : i32
    %c0_i32_1 = arith.constant 0 : i32
    return %c0_i32, %c0_i32_0 : i32, i32
  }
  func.func @transform_6(%arg0: i32) -> (i32, i32) {
    %c0_i32 = arith.constant 0 : i32
    %c0_i32_0 = arith.constant 0 : i32
    %c0_i32_1 = arith.constant 0 : i32
    return %c0_i32, %c0_i32_0 : i32, i32
  }
  func.func @transform_7(%arg0: i32) -> (i32, i32) {
    %c0_i32 = arith.constant 0 : i32
    %c0_i32_0 = arith.constant 0 : i32
    return %arg0, %c0_i32 : i32, i32
  }
}

</mosaic_0001>

<bundles_post_ra>
// kernel: tpu_custom_call.1
= control target key start
LH: loop header
LB: loop body
LE: loop exit
PB: predicated region body
PF: predicated region fallthrough
CT: control target
= control target key end

     0   :  { %s1096_s0 = inlined_call_operand.hbm [shape: bf16[64,128], index: 0, kind: input, shape index: {}]   ;;  %s1097_s1 = inlined_call_operand.hbm [shape: bf16[128,128], index: 1, kind: input, shape index: {}]   ;;  %s1098_s2 = inlined_call_operand.vmem [shape: f32[1,128], index: 2, kind: input, shape index: {}]   ;;  %s1099_s3 = inlined_call_operand.hbm [shape: bf16[128,128], index: 3, kind: input, shape index: {}]   ;;  %s1100_s4 = inlined_call_operand.vmem [shape: f32[1,128], index: 4, kind: input, shape index: {}]   ;;  %s1101_s5 = inlined_call_operand.vmem [shape: f32[1,128], index: 5, kind: input, shape index: {}]   ;;  %s1102_s6 = inlined_call_operand.<no memory space> [shape: f32[1,1], index: 6, kind: input, shape index: {}]   ;;  %s1103_s7 = inlined_call_operand.vmem [shape: f32[64,1], index: 7, kind: output, shape index: {}]  }
   0x1   :  { %v12_v0 = vstv %s1102_s6 }
   0x2   :  { %13 = vst [vmem:[#allocation2] sm:$0x1] %v12_v0 }
   0x3   :  { %14 = vsyncpa [#allocation4], 0 }
   0x4   :  { %16 = vsyncpa [#allocation4 + $0x1], 0 }
   0x5   :  { %17 = vsyncpa [#allocation6], 0  ;;  %s966_s26 = smov 0   ;;  %s968_s27 = smov 0  }
   0x6   :  { %s970_s28 = smov 0   ;;  %s972_s29 = smov 0  }
   0x7 LB: > { %s620_s6 = sadd.s32 4294967295, %s917_s29   ;;  %p43_p0 = scmp.ne.s32.totalorder %s909_s27, %s905_s26  ;;  %s917_s29 = sphi %s972_s29, %s1112_s29   ;;  %s913_s28 = sphi %s970_s28, %s1111_s28   ;;  %s909_s27 = sphi %s968_s27, %s1110_s27   ;;  %s905_s26 = sphi %s966_s26, %s1109_s26  }
   0x8   : > { %p988_p1 = scmp.eq.s32.totalorder %s620_s6, 0  ;;  %p622_p2 = scmp.ge.s32.totalorder %s917_s29, 1 }
   0x9   : > { %p206_p3 = scmp.lt.s32.totalorder %s917_s29, 5  ;;  %s217_s11 = sshll.u32 %s1097_s1, 4  ;;  %s218_s11 = int_to_ptr.hbm [resolvable:$true] %s217_s11 }
   0xa   : > { %p996_p4 = por %p988_p1, %p43_p0  ;;  %s919_s13 = smov [#allocation5]  }
   0xb   : > { %p1003_p5 = pnand %p622_p2, %p206_p3  ;;  %s219_s14 = sshll.u32 %s919_s13, 4  ;;  %s220_s14 = int_to_ptr.vmem [resolvable:$true] %s219_s14 }
   0xc   : > { %s234_s17 = sshll.u32 %s1099_s3, 4  ;;  %s920_s18 = smov 64   ;;  %s235_s17 = int_to_ptr.hbm [resolvable:$true] %s234_s17 }
   0xd   : > { %p733_p6 = pneg %p1003_p5  ;;  %s921_s19 = smov 4  }
   0xe   : > { %s922_s20 = smov [#allocation7]   ;;  %s1021_s22 = sadd.s32 1, %s917_s29  }
   0xf   : > { %p734_p7 = pnand %p733_p6, %p988_p1  ;;  %s236_s21 = sshll.u32 %s922_s20, 4  ;;  %s237_s21 = int_to_ptr.vmem [resolvable:$true] %s236_s21 }
  0x10   : > { %s30_s23 = sadd.s32 1, %s913_s28  ;;  %s27_s24 = ssub.s32 %s917_s29, %s1021_s22 }
  0x11   : > { %736 = dma.hbm_to_vmem [thread:$0]  (!%p734_p7), %s218_s11, 1024, %s220_s14, [#allocation6], %s920_s18, %s920_s18, %s921_s19  }
  0x12   : > { %739 = dma.hbm_to_vmem [thread:$0]  (!%p734_p7), %s235_s17, 1024, %s237_s21, [#allocation6], %s920_s18, %s920_s18, %s921_s19  }
  0x13   : > { %p37_p8 = scmp.ne.s32.totalorder %s913_s28, %s909_s27  ;;  %p28_p9 = scmp.eq.s32.totalorder %s27_s24, 0 }
  0x14   : > { %p38_p10 = scmp.eq.s32.totalorder %s917_s29, 0  ;;  %s259_s25 = sand.u32 1, %s913_s28  }
  0x15   : > { %s1031_s26 = scalar_select %p28_p9, %s913_s28, %s30_s23  }
  0x16   : > { %p39_p11 = por %p38_p10, %p37_p8  ;;  %p746_p12 = scmp.lt.s32.totalorder %s917_s29, 4 }
  0x17   : > { %s626_s9 = sshll.u32 %s259_s25, 3  ;;  %s705_s10 = sshll.u32 %s917_s29, 3 }
  0x18   : > { %s268_s14 = scalar_lea.hbm %s1096_s0, %s705_s10  ;;  %s263_s16 = scalar_lea.vmem [#allocation3], %s626_s9 }
  0x19   : > { %s269_s15 = sshll.u32 %s268_s14, 4  ;;  %s271_s17 = sshll.u32 %s263_s16, 4  ;;  %s270_s15 = int_to_ptr.hbm [resolvable:$true] %s269_s15  ;;  %s272_s17 = int_to_ptr.vmem [resolvable:$true] %s271_s17 }
  0x1a   : > { %p1038_p13 = pnand %p746_p12, %p39_p11  ;;  %s260_s21 = scalar_lea.sflag [#allocation4], %s259_s25 }
  0x1b   : > { %s849_s23 = sshra.s32 %s270_s15, 4  ;;  %s856_s9 = scalar_lea.hbm %s1096_s0, 32  ;;  %s850_s23 = int_to_ptr.hbm [resolvable:$true] %s849_s23 }
  0x1c   : > { %s851_s24 = scalar_lea.hbm %s850_s23, 8  ;;  %p853_p2 = pneg %p1038_p13 }
  0x1d   : > { %p852_p0 = scmp.ne.s32.totalorder %s850_s23, %s851_s24  ;;  %p857_p7 = scmp.lt.s32.totalorder %s850_s23, %s1096_s0 }
  0x1e   : > { %p858_p8 = scmp.lt.s32.totalorder %s856_s9, %s851_s24 }
  0x1f   : > { %p854_p3 = pnand %p853_p2, %p852_p0 }
  0x20   : > { %p859_p9 = por %p858_p8, %p857_p7 }
  0x21   : > { %p855_p6 = pneg %p854_p3 }
  0x23   : > { %p860_p10 = pnand %p859_p9, %p855_p6 }
  0x25   : > { %863 = shalt.err (!%p860_p10)
}
  0x26   : > { %743 = dma.hbm_to_vmem [thread:$0]  (!%p1038_p13), %s270_s15, 128, %s272_s17, %s260_s21, %s920_s18, %s920_s18, %s921_s19  }
  0x27   : > { %283 = sbr.rel (%p1003_p5) target bundleno = 478 (0x1de), region = 48  ;;  %s285_s25 = sand.u32 (!%p1003_p5), 1, %s909_s27  }
  0x28   : > { %s1058_s16 = sshll.u32 (!%p1003_p5), %s285_s25, 3  ;;  %s286_s23 = scalar_lea.sflag (!%p1003_p5), [#allocation4], %s285_s25 }
  0x29   : > { %s289_s24 = scalar_lea.vmem (!%p1003_p5), [#allocation3], %s1058_s16 }
  0x2c   : > { %896 = dma.done.wait (%p996_p4), %s286_s23, 128  }
  0x2d   : > { %898 = vsyncadd (%p996_p4), %s286_s23, 4294967168 }
  0x2e   : > { %900 = dma.done.wait (%p988_p1), [#allocation6], 2048  }
  0x2f   : > { %902 = vsyncadd (%p988_p1), [#allocation6], 4294965248  ;;  %v714_v1 = vld [vmem:[#allocation5 + $0x38] sm:$0xff]  ;;  %v713_v2 = vld [vmem:[#allocation5 + $0x30] sm:$0xff]  ;;  %s633_s17 = sshll.u32 %s620_s6, 1  ;;  %vm531_vm0 = vcmask 7168  }
  0x30   : > { %414 = vmatpush.bf16.msra.mxu0 %v714_v1  ;;  %v722_v3 = vld [vmem:[#allocation7 + $0x38] sm:$0xff]  ;;  %v721_v4 = vld [vmem:[#allocation7 + $0x30] sm:$0xff]  ;;  %v712_v5 = vld [vmem:[#allocation5 + $0x28] sm:$0xff]  ;;  %p333_p1 = scmp.lt.s32.totalorder %s633_s17, 7 }
  0x31   : > { %499 = vmatpush.bf16.msra.mxu1 %v722_v3  ;;  %v720_v6 = vld [vmem:[#allocation7 + $0x28] sm:$0xff]  ;;  %v711_v7 = vld [vmem:[#allocation5 + $0x20] sm:$0xff]  ;;  %v710_v9 = vld [vmem:[#allocation5 + $0x18] sm:$0xff] }
  0x32   : > { %v719_v8 = vld [vmem:[#allocation7 + $0x20] sm:$0xff]  ;;  %v709_v10 = vld [vmem:[#allocation5 + $0x10] sm:$0xff]  ;;  %v708_v11 = vld [vmem:[#allocation5 + $0x8] sm:$0xff]  ;;  %s1114_s17 = smov (!%p333_p1, %s633_s17), 7 }
  0x33   : > { %v707_v12 = vld [vmem:[#allocation5] sm:$0xff]  ;;  %v706_v13 = vld [vmem:[%s289_s24] sm:$0xff]  ;;  %v716_v16 = vld [vmem:[#allocation7 + $0x8] sm:$0xff]  ;;  %s634_s20 = sshll.u32 %s1114_s17, 3 }
  0x34   : > { %415 = vmatpush.bf16.msra.mxu0 %v713_v2  ;;  %v718_v14 = vld [vmem:[#allocation7 + $0x18] sm:$0xff]  ;;  %v717_v15 = vld [vmem:[#allocation7 + $0x10] sm:$0xff]  ;;  %v715_v17 = vld [vmem:[#allocation7] sm:$0xff]  ;;  %s336_s11 = scalar_lea.vmem %s1103_s7, %s634_s20 }
  0x35   : > { %500 = vmatpush.bf16.msra.mxu1 %v721_v4  ;;  %v785_v19 = vld [vmem:[%s1098_s2] ss:$0 sm:$0xff] }
  0x36   : > { %v786_v26 = vld [vmem:[%s1100_s4] ss:$0 sm:$0xff] }
  0x37   : > { %v787_v29 = vld [vmem:[%s1101_s5] ss:$0 sm:$0xff] }
  0x38   : > { %416 = vmatpush.bf16.msra.mxu0 %v712_v5  ;;  %v788_v36 = vld [vmem:[#allocation2] ss:$0 sm:$0xff] }
  0x39   : > { %501 = vmatpush.bf16.msra.mxu1 %v720_v6 }
  0x3c   : > { %417 = vmatpush.bf16.msra.mxu0 %v711_v7 }
  0x3d   : > { %502 = vmatpush.bf16.msra.mxu1 %v719_v8 }
  0x40   : > { %418 = vmatpush.bf16.msra.mxu0 %v710_v9 }
  0x41   : > { %503 = vmatpush.bf16.msra.mxu1 %v718_v14 }
  0x44   : > { %419 = vmatpush.bf16.msra.mxu0 %v709_v10 }
  0x45   : > { %504 = vmatpush.bf16.msra.mxu1 %v717_v15 }
  0x48   : > { %420 = vmatpush.bf16.msra.mxu0 %v708_v11 }
  0x49   : > { %505 = vmatpush.bf16.msra.mxu1 %v716_v16 }
  0x4c   : > { %421 = vmatpush.bf16.msra.mxu0 %v707_v12 }
  0x4d   : > { %506 = vmatpush.bf16.msra.mxu1 %v715_v17 }
  0x4f   : > { %422 = vmatmul.bf16.vlgmr.msra.gmra.mxu0 %v706_v13 }
  0xcc   : > { %v423_v18 = vpop.f32.mrf.mxu0 }
  0xcd   : > { %v424_v20 = vadd.f32 %v785_v19, %v423_v18 }
  0xcf   : > { %v428_v23 = vmax.f32 %v424_v20, 0.0 }
  0xd4   : > { %v425_v21 = vpop.f32.mrf.mxu0 }
  0xd5   : > { %v426_v22 = vadd.f32 %v785_v19, %v425_v21 }
  0xd7   : > { %v429_v24 = vmax.f32 %v426_v22, 0.0 }
  0xd9   : > { %v430_v25 = vpack.c.bf16 %v429_v24, %v428_v23 }
  0xdb   : > { %507 = vmatmul.bf16.vlgmr.msra.gmra.mxu1 %v430_v25 }
 0x158   : > { %v508_v27 = vpop.f32.mrf.mxu1 }
 0x159   : > { %v509_v28 = vadd.f32 %v786_v26, %v508_v27 }
 0x15b   : > { %v513_v30 = vmax.f32 %v509_v28, 0.0 }
 0x15d   : > { %v519_v31 = vmul.f32 %v787_v29, %v513_v30 }
 0x15f   : > { %521 = vadd.xlane.f32.xlu0 %v519_v31 }
 0x160   : > { %v510_v32 = vpop.f32.mrf.mxu1 }
 0x161   : > { %v511_v33 = vadd.f32 %v786_v26, %v510_v32 }
 0x163   : > { %v514_v34 = vmax.f32 %v511_v33, 0.0 }
 0x165   : > { %v520_v35 = vmul.f32 %v787_v29, %v514_v34 }
 0x167   : > { %523 = vadd.xlane.f32.xlu0 %v520_v35 }
 0x1d2   : > { %v522_v37 = vpop.xlane.xlu0 %521 }
 0x1d3   : > { %v529_v38 = vadd.f32 %v788_v36, %v522_v37 }
 0x1d5   : > { %532 = vst.msk [vmem:[%s336_s11] sm:$0xff] %vm531_vm0, %v529_v38 }
 0x1da   : > { %v524_v39 = vpop.xlane.xlu0 %523 }
 0x1db   : > { %v530_v40 = vadd.f32 %v788_v36, %v524_v39 }
 0x1dd   : > { %533 = vst.msk [vmem:[%s336_s11 + $0x8] sm:$0xff] %vm531_vm0, %v530_v40 }
 0x1de PF: > { %s1108_s29 = smov %s1031_s26  ;;  %p20_p4 = scmp.ge.s32.totalorder %s1021_s22, 6  }
 0x1df   : > { %s1109_s26 = smov %s909_s27  ;;  %s1110_s27 = smov %s913_s28 }
 0x1e0   : > { %s1111_s28 = smov %s1108_s29  ;;  %s1112_s29 = smov %s1021_s22 }
 0x1e1   :  { %22 = sbr.rel (!%p20_p4) target bundleno = 7 (0x7), region = 96 }
 0x1e6   :  { %556 = vsyncpa [#allocation4], 1 }
 0x1e7   :  { %558 = vsyncpa [#allocation4 + $0x1], 1 }
 0x1e8   :  { %559 = vsyncpa [#allocation6], 1 }

// kernel: tpu_custom_call.1
= control target key start
LH: loop header
LB: loop body
LE: loop exit
PB: predicated region body
PF: predicated region fallthrough
CT: control target
= control target key end

     0   :  { %s1096_s0 = inlined_call_operand.hbm [shape: bf16[64,128], index: 0, kind: input, shape index: {}]   ;;  %s1097_s1 = inlined_call_operand.hbm [shape: bf16[128,128], index: 1, kind: input, shape index: {}]   ;;  %s1098_s2 = inlined_call_operand.vmem [shape: f32[1,128], index: 2, kind: input, shape index: {}]   ;;  %s1099_s3 = inlined_call_operand.hbm [shape: bf16[128,128], index: 3, kind: input, shape index: {}]   ;;  %s1100_s4 = inlined_call_operand.vmem [shape: f32[1,128], index: 4, kind: input, shape index: {}]   ;;  %s1101_s5 = inlined_call_operand.vmem [shape: f32[1,128], index: 5, kind: input, shape index: {}]   ;;  %s1102_s6 = inlined_call_operand.<no memory space> [shape: f32[1,1], index: 6, kind: input, shape index: {}]   ;;  %s1103_s7 = inlined_call_operand.vmem [shape: f32[64,1], index: 7, kind: output, shape index: {}]  }
   0x1   :  { %v12_v0 = vstv %s1102_s6 }
   0x2   :  { %13 = vst [vmem:[#allocation2] sm:$0x1] %v12_v0 }
   0x3   :  { %14 = vsyncpa [#allocation4], 0 }
   0x4   :  { %16 = vsyncpa [#allocation4 + $0x1], 0 }
   0x5   :  { %17 = vsyncpa [#allocation6], 0  ;;  %s966_s26 = smov 0   ;;  %s968_s27 = smov 0  }
   0x6   :  { %s970_s28 = smov 0   ;;  %s972_s29 = smov 0  }
   0x7 LB: > { %s620_s6 = sadd.s32 4294967295, %s917_s29   ;;  %p43_p0 = scmp.ne.s32.totalorder %s909_s27, %s905_s26  ;;  %s917_s29 = sphi %s972_s29, %s1112_s29   ;;  %s913_s28 = sphi %s970_s28, %s1111_s28   ;;  %s909_s27 = sphi %s968_s27, %s1110_s27   ;;  %s905_s26 = sphi %s966_s26, %s1109_s26  }
   0x8   : > { %p988_p1 = scmp.eq.s32.totalorder %s620_s6, 0  ;;  %p622_p2 = scmp.ge.s32.totalorder %s917_s29, 1 }
   0x9   : > { %p206_p3 = scmp.lt.s32.totalorder %s917_s29, 5  ;;  %s217_s11 = sshll.u32 %s1097_s1, 4  ;;  %s218_s11 = int_to_ptr.hbm [resolvable:$true] %s217_s11 }
   0xa   : > { %p996_p4 = por %p988_p1, %p43_p0  ;;  %s919_s13 = smov [#allocation5]  }
   0xb   : > { %p1003_p5 = pnand %p622_p2, %p206_p3  ;;  %s219_s14 = sshll.u32 %s919_s13, 4  ;;  %s220_s14 = int_to_ptr.vmem [resolvable:$true] %s219_s14 }
   0xc   : > { %s234_s17 = sshll.u32 %s1099_s3, 4  ;;  %s920_s18 = smov 64   ;;  %s235_s17 = int_to_ptr.hbm [resolvable:$true] %s234_s17 }
   0xd   : > { %p733_p6 = pneg %p1003_p5  ;;  %s921_s19 = smov 4  }
   0xe   : > { %s922_s20 = smov [#allocation7]   ;;  %s1021_s22 = sadd.s32 1, %s917_s29  }
   0xf   : > { %p734_p7 = pnand %p733_p6, %p988_p1  ;;  %s236_s21 = sshll.u32 %s922_s20, 4  ;;  %s237_s21 = int_to_ptr.vmem [resolvable:$true] %s236_s21 }
  0x10   : > { %s30_s23 = sadd.s32 1, %s913_s28  ;;  %s27_s24 = ssub.s32 %s917_s29, %s1021_s22 }
  0x11   : > { %736 = dma.hbm_to_vmem [thread:$0]  (!%p734_p7), %s218_s11, 1024, %s220_s14, [#allocation6], %s920_s18, %s920_s18, %s921_s19  }
  0x12   : > { %739 = dma.hbm_to_vmem [thread:$0]  (!%p734_p7), %s235_s17, 1024, %s237_s21, [#allocation6], %s920_s18, %s920_s18, %s921_s19  }
  0x13   : > { %p37_p8 = scmp.ne.s32.totalorder %s913_s28, %s909_s27  ;;  %p28_p9 = scmp.eq.s32.totalorder %s27_s24, 0 }
  0x14   : > { %p38_p10 = scmp.eq.s32.totalorder %s917_s29, 0  ;;  %s259_s25 = sand.u32 1, %s913_s28  }
  0x15   : > { %s1031_s26 = scalar_select %p28_p9, %s913_s28, %s30_s23  }
  0x16   : > { %p39_p11 = por %p38_p10, %p37_p8  ;;  %p746_p12 = scmp.lt.s32.totalorder %s917_s29, 4 }
  0x17   : > { %s626_s9 = sshll.u32 %s259_s25, 3  ;;  %s705_s10 = sshll.u32 %s917_s29, 3 }
  0x18   : > { %s268_s14 = scalar_lea.hbm %s1096_s0, %s705_s10  ;;  %s263_s16 = scalar_lea.vmem [#allocation3], %s626_s9 }
  0x19   : > { %s269_s15 = sshll.u32 %s268_s14, 4  ;;  %s271_s17 = sshll.u32 %s263_s16, 4  ;;  %s270_s15 = int_to_ptr.hbm [resolvable:$true] %s269_s15  ;;  %s272_s17 = int_to_ptr.vmem [resolvable:$true] %s271_s17 }
  0x1a   : > { %p1038_p13 = pnand %p746_p12, %p39_p11  ;;  %s260_s21 = scalar_lea.sflag [#allocation4], %s259_s25 }
  0x1b   : > { %s849_s23 = sshra.s32 %s270_s15, 4  ;;  %s856_s9 = scalar_lea.hbm %s1096_s0, 32  ;;  %s850_s23 = int_to_ptr.hbm [resolvable:$true] %s849_s23 }
  0x1c   : > { %s851_s24 = scalar_lea.hbm %s850_s23, 8  ;;  %p853_p2 = pneg %p1038_p13 }
  0x1d   : > { %p852_p0 = scmp.ne.s32.totalorder %s850_s23, %s851_s24  ;;  %p857_p7 = scmp.lt.s32.totalorder %s850_s23, %s1096_s0 }
  0x1e   : > { %p858_p8 = scmp.lt.s32.totalorder %s856_s9, %s851_s24 }
  0x1f   : > { %p854_p3 = pnand %p853_p2, %p852_p0 }
  0x20   : > { %p859_p9 = por %p858_p8, %p857_p7 }
  0x21   : > { %p855_p6 = pneg %p854_p3 }
  0x23   : > { %p860_p10 = pnand %p859_p9, %p855_p6 }
  0x25   : > { %863 = shalt.err (!%p860_p10)
}
  0x26   : > { %743 = dma.hbm_to_vmem [thread:$0]  (!%p1038_p13), %s270_s15, 128, %s272_s17, %s260_s21, %s920_s18, %s920_s18, %s921_s19  }
  0x27   : > { %283 = sbr.rel (%p1003_p5) target bundleno = 478 (0x1de), region = 48  ;;  %s285_s25 = sand.u32 (!%p1003_p5), 1, %s909_s27  }
  0x28   : > { %s1058_s16 = sshll.u32 (!%p1003_p5), %s285_s25, 3  ;;  %s286_s23 = scalar_lea.sflag (!%p1003_p5), [#allocation4], %s285_s25 }
  0x29   : > { %s289_s24 = scalar_lea.vmem (!%p1003_p5), [#allocation3], %s1058_s16 }
  0x2c   : > { %896 = dma.done.wait (%p996_p4), %s286_s23, 128  }
  0x2d   : > { %898 = vsyncadd (%p996_p4), %s286_s23, 4294967168 }
  0x2e   : > { %900 = dma.done.wait (%p988_p1), [#allocation6], 2048  }
  0x2f   : > { %902 = vsyncadd (%p988_p1), [#allocation6], 4294965248  ;;  %v714_v1 = vld [vmem:[#allocation5 + $0x38] sm:$0xff]  ;;  %v713_v2 = vld [vmem:[#allocation5 + $0x30] sm:$0xff]  ;;  %s633_s17 = sshll.u32 %s620_s6, 1  ;;  %vm531_vm0 = vcmask 7168  }
  0x30   : > { %414 = vmatpush.bf16.msra.mxu0 %v714_v1  ;;  %v722_v3 = vld [vmem:[#allocation7 + $0x38] sm:$0xff]  ;;  %v721_v4 = vld [vmem:[#allocation7 + $0x30] sm:$0xff]  ;;  %v712_v5 = vld [vmem:[#allocation5 + $0x28] sm:$0xff]  ;;  %p333_p1 = scmp.lt.s32.totalorder %s633_s17, 7 }
  0x31   : > { %499 = vmatpush.bf16.msra.mxu1 %v722_v3  ;;  %v720_v6 = vld [vmem:[#allocation7 + $0x28] sm:$0xff]  ;;  %v711_v7 = vld [vmem:[#allocation5 + $0x20] sm:$0xff]  ;;  %v710_v9 = vld [vmem:[#allocation5 + $0x18] sm:$0xff] }
  0x32   : > { %v719_v8 = vld [vmem:[#allocation7 + $0x20] sm:$0xff]  ;;  %v709_v10 = vld [vmem:[#allocation5 + $0x10] sm:$0xff]  ;;  %v708_v11 = vld [vmem:[#allocation5 + $0x8] sm:$0xff]  ;;  %s1114_s17 = smov (!%p333_p1, %s633_s17), 7 }
  0x33   : > { %v707_v12 = vld [vmem:[#allocation5] sm:$0xff]  ;;  %v706_v13 = vld [vmem:[%s289_s24] sm:$0xff]  ;;  %v716_v16 = vld [vmem:[#allocation7 + $0x8] sm:$0xff]  ;;  %s634_s20 = sshll.u32 %s1114_s17, 3 }
  0x34   : > { %415 = vmatpush.bf16.msra.mxu0 %v713_v2  ;;  %v718_v14 = vld [vmem:[#allocation7 + $0x18] sm:$0xff]  ;;  %v717_v15 = vld [vmem:[#allocation7 + $0x10] sm:$0xff]  ;;  %v715_v17 = vld [vmem:[#allocation7] sm:$0xff]  ;;  %s336_s11 = scalar_lea.vmem %s1103_s7, %s634_s20 }
  0x35   : > { %500 = vmatpush.bf16.msra.mxu1 %v721_v4  ;;  %v785_v19 = vld [vmem:[%s1098_s2] ss:$0 sm:$0xff] }
  0x36   : > { %v786_v26 = vld [vmem:[%s1100_s4] ss:$0 sm:$0xff] }
  0x37   : > { %v787_v29 = vld [vmem:[%s1101_s5] ss:$0 sm:$0xff] }
  0x38   : > { %416 = vmatpush.bf16.msra.mxu0 %v712_v5  ;;  %v788_v36 = vld [vmem:[#allocation2] ss:$0 sm:$0xff] }
  0x39   : > { %501 = vmatpush.bf16.msra.mxu1 %v720_v6 }
  0x3c   : > { %417 = vmatpush.bf16.msra.mxu0 %v711_v7 }
  0x3d   : > { %502 = vmatpush.bf16.msra.mxu1 %v719_v8 }
  0x40   : > { %418 = vmatpush.bf16.msra.mxu0 %v710_v9 }
  0x41   : > { %503 = vmatpush.bf16.msra.mxu1 %v718_v14 }
  0x44   : > { %419 = vmatpush.bf16.msra.mxu0 %v709_v10 }
  0x45   : > { %504 = vmatpush.bf16.msra.mxu1 %v717_v15 }
  0x48   : > { %420 = vmatpush.bf16.msra.mxu0 %v708_v11 }
  0x49   : > { %505 = vmatpush.bf16.msra.mxu1 %v716_v16 }
  0x4c   : > { %421 = vmatpush.bf16.msra.mxu0 %v707_v12 }
  0x4d   : > { %506 = vmatpush.bf16.msra.mxu1 %v715_v17 }
  0x4f   : > { %422 = vmatmul.bf16.vlgmr.msra.gmra.mxu0 %v706_v13 }
  0xcc   : > { %v423_v18 = vpop.f32.mrf.mxu0 }
  0xcd   : > { %v424_v20 = vadd.f32 %v785_v19, %v423_v18 }
  0xcf   : > { %v428_v23 = vmax.f32 %v424_v20, 0.0 }
  0xd4   : > { %v425_v21 = vpop.f32.mrf.mxu0 }
  0xd5   : > { %v426_v22 = vadd.f32 %v785_v19, %v425_v21 }
  0xd7   : > { %v429_v24 = vmax.f32 %v426_v22, 0.0 }
  0xd9   : > { %v430_v25 = vpack.c.bf16 %v429_v24, %v428_v23 }
  0xdb   : > { %507 = vmatmul.bf16.vlgmr.msra.gmra.mxu1 %v430_v25 }
 0x158   : > { %v508_v27 = vpop.f32.mrf.mxu1 }
 0x159   : > { %v509_v28 = vadd.f32 %v786_v26, %v508_v27 }
 0x15b   : > { %v513_v30 = vmax.f32 %v509_v28, 0.0 }
 0x15d   : > { %v519_v31 = vmul.f32 %v787_v29, %v513_v30 }
 0x15f   : > { %521 = vadd.xlane.f32.xlu0 %v519_v31 }
 0x160   : > { %v510_v32 = vpop.f32.mrf.mxu1 }
 0x161   : > { %v511_v33 = vadd.f32 %v786_v26, %v510_v32 }
 0x163   : > { %v514_v34 = vmax.f32 %v511_v33, 0.0 }
 0x165   : > { %v520_v35 = vmul.f32 %v787_v29, %v514_v34 }
 0x167   : > { %523 = vadd.xlane.f32.xlu0 %v520_v35 }
 0x1d2   : > { %v522_v37 = vpop.xlane.xlu0 %521 }
 0x1d3   : > { %v529_v38 = vadd.f32 %v788_v36, %v522_v37 }
 0x1d5   : > { %532 = vst.msk [vmem:[%s336_s11] sm:$0xff] %vm531_vm0, %v529_v38 }
 0x1da   : > { %v524_v39 = vpop.xlane.xlu0 %523 }
 0x1db   : > { %v530_v40 = vadd.f32 %v788_v36, %v524_v39 }
 0x1dd   : > { %533 = vst.msk [vmem:[%s336_s11 + $0x8] sm:$0xff] %vm531_vm0, %v530_v40 }
 0x1de PF: > { %s1108_s29 = smov %s1031_s26  ;;  %p20_p4 = scmp.ge.s32.totalorder %s1021_s22, 6  }
 0x1df   : > { %s1109_s26 = smov %s909_s27  ;;  %s1110_s27 = smov %s913_s28 }
 0x1e0   : > { %s1111_s28 = smov %s1108_s29  ;;  %s1112_s29 = smov %s1021_s22 }
 0x1e1   :  { %22 = sbr.rel (!%p20_p4) target bundleno = 7 (0x7), region = 96 }
 0x1e6   :  { %556 = vsyncpa [#allocation4], 1 }
 0x1e7   :  { %558 = vsyncpa [#allocation4 + $0x1], 1 }
 0x1e8   :  { %559 = vsyncpa [#allocation6], 1 }

</bundles_post_ra>
